<compile_context>
chip_gen: v6e
topology: v6e:2x2x1
jax: 0.10.0
libtpu: 0.0.40
codegen_flags: <defaults>
</compile_context>

<pallas_src>
import functools

import jax
import jax.numpy as jnp
from jax.experimental import pallas as pl
from jax.experimental.pallas import tpu as pltpu


_VMEM_LIMIT = 32 * 1024 * 1024  # explicit scoped-VMEM budget (safe on v5e/v6e/v7x)


def _tile(dim, target):
    """Largest clean tile: `target` if it divides `dim`, else the full dim."""
    # TODO(synk): for ragged dims, pad to an (8,128)-aligned tile multiple (with
    # -inf masking of padded keys in attention) instead of the full-extent
    # fallback; the fallback is correct but disables pipelining on that axis.
    if dim <= target:
        return dim
    if dim % target == 0:
        return target
    return dim


# ----------------------------------------------------------------------------
# Kernel 1: fused SiLU + Linear (bf16 operands, f32 VMEM accumulator).
# ----------------------------------------------------------------------------
def _silu_linear_kernel(x_ref, w_ref, b_ref, o_ref, acc_ref):
    @pl.when(pl.program_id(2) == 0)
    def _init():
        acc_ref[...] = jnp.zeros_like(acc_ref)

    x = x_ref[...].astype(jnp.float32)                     # bf16 load, f32 SiLU
    h = (x * jax.nn.sigmoid(x)).astype(jnp.bfloat16)       # SiLU (VPU + EUP)
    acc_ref[...] += jnp.dot(h, w_ref[...],                 # w already bf16
                            preferred_element_type=jnp.float32)

    @pl.when(pl.program_id(2) == pl.num_programs(2) - 1)
    def _finalize():
        o_ref[...] = (acc_ref[...] + b_ref[...]).astype(o_ref.dtype)


def silu_linear(x, w_t, b, *, out_dtype=jnp.bfloat16, tm=256, tn=512, tk=512):
    """y = SiLU(x) @ w_t + b.  x: (M, Din) bf16, w_t: (Din, Dout) bf16, b: (1, Dout) f32."""
    M, Din = x.shape
    Dout = w_t.shape[1]
    TM, TN, TK = _tile(M, tm), _tile(Dout, tn), _tile(Din, tk)
    grid = (M // TM, Dout // TN, Din // TK)
    return pl.pallas_call(
        _silu_linear_kernel,
        out_shape=jax.ShapeDtypeStruct((M, Dout), out_dtype),
        grid_spec=pltpu.PrefetchScalarGridSpec(
            num_scalar_prefetch=0,
            grid=grid,
            in_specs=[
                pl.BlockSpec((TM, TK), lambda i, j, k: (i, k)),
                pl.BlockSpec((TK, TN), lambda i, j, k: (k, j)),
                pl.BlockSpec((1, TN), lambda i, j, k: (0, j)),
            ],
            out_specs=pl.BlockSpec((TM, TN), lambda i, j, k: (i, j)),
            scratch_shapes=[pltpu.VMEM((TM, TN), jnp.float32)],
        ),
        compiler_params=pltpu.CompilerParams(
            dimension_semantics=("parallel", "parallel", "arbitrary"),
            vmem_limit_bytes=_VMEM_LIMIT),
    )(x, w_t, b)


# ----------------------------------------------------------------------------
# Kernel 2: flash attention, grid (batch, head, q-tiles, k-tiles), online
#           softmax over the k/v tile axis.  Per-head blocks are (TQ, D) /
#           (TK, D) with D as the full last axis -> lane-aligned MXU operands,
#           no in-kernel head slicing and no epilogue concatenate.
# ----------------------------------------------------------------------------
def _flash_attn_kernel(q_ref, k_ref, v_ref, o_ref, m_scr, l_scr, acc_scr):
    ki = pl.program_id(3)

    @pl.when(ki == 0)
    def _init():
        m_scr[...] = jnp.full_like(m_scr, -jnp.inf)
        l_scr[...] = jnp.zeros_like(l_scr)
        acc_scr[...] = jnp.zeros_like(acc_scr)

    q = q_ref[0, 0]                                        # (TQ, D) bf16, scale pre-folded
    k = k_ref[0, 0]                                        # (TK, D) bf16
    # QK^T: contract last dims directly (no transpose of k).
    s = jax.lax.dot_general(q, k, (((1,), (1,)), ((), ())),
                            preferred_element_type=jnp.float32)   # (TQ, TK)

    m_prev = m_scr[...]                                    # (TQ, 1)
    m_new = jnp.maximum(m_prev, jnp.max(s, axis=-1, keepdims=True))
    alpha = jnp.exp(m_prev - m_new)
    p = jnp.exp(s - m_new)
    l_scr[...] = alpha * l_scr[...] + jnp.sum(p, axis=-1, keepdims=True)
    acc_scr[...] = alpha * acc_scr[...] + jnp.dot(
        p.astype(jnp.bfloat16), v_ref[0, 0], preferred_element_type=jnp.float32)
    m_scr[...] = m_new

    @pl.when(ki == pl.num_programs(3) - 1)
    def _finalize():
        inv = pl.reciprocal(l_scr[...], approx=True)       # EUP slot
        o_ref[0, 0] = (acc_scr[...] * inv).astype(o_ref.dtype)


def flash_mha(q, k, v, *, tq=256, tk=128, out_dtype=jnp.bfloat16):
    """q: (b,h,nq,D) bf16 ; k,v: (b,h,nk,D) bf16 -> (b,h,nq,D) bf16."""
    b, n_head, nq, D = q.shape
    nk = k.shape[2]
    TQ, TK = _tile(nq, tq), _tile(nk, tk)
    grid = (b, n_head, nq // TQ, nk // TK)                 # reduction axis last
    return pl.pallas_call(
        _flash_attn_kernel,
        out_shape=jax.ShapeDtypeStruct((b, n_head, nq, D), out_dtype),
        grid_spec=pltpu.PrefetchScalarGridSpec(
            num_scalar_prefetch=0,
            grid=grid,
            in_specs=[
                pl.BlockSpec((1, 1, TQ, D), lambda bi, hi, qi, ki: (bi, hi, qi, 0)),
                pl.BlockSpec((1, 1, TK, D), lambda bi, hi, qi, ki: (bi, hi, ki, 0)),
                pl.BlockSpec((1, 1, TK, D), lambda bi, hi, qi, ki: (bi, hi, ki, 0)),
            ],
            out_specs=pl.BlockSpec((1, 1, TQ, D),
                                   lambda bi, hi, qi, ki: (bi, hi, qi, 0)),
            scratch_shapes=[
                pltpu.VMEM((TQ, 1), jnp.float32),          # running max
                pltpu.VMEM((TQ, 1), jnp.float32),          # running denom
                pltpu.VMEM((TQ, D), jnp.float32),          # running acc
            ],
        ),
        compiler_params=pltpu.CompilerParams(
            dimension_semantics=("parallel", "parallel", "parallel", "arbitrary"),
            vmem_limit_bytes=_VMEM_LIMIT),
    )(q, k, v)


# ----------------------------------------------------------------------------
# Module wrapper.
# ----------------------------------------------------------------------------
def attention_forward(params, fr, to=None):
    """Reproduces Attention.forward.  fr, to: (b, n, dim) f32 -> (b, n, inner) f32."""
    if to is None:
        to = fr
    n_head = params["n_head"]
    D = params["head_dim"]
    inner = n_head * D

    b, nq, dim = fr.shape
    nk = to.shape[1]

    # Single bf16 cast of the activations (halves the x HBM stream).
    fr2 = fr.reshape(b * nq, dim).astype(jnp.bfloat16)
    to2 = to.reshape(b * nk, dim).astype(jnp.bfloat16)

    # Softmax scale pre-folded into the Q projection weights/bias.
    q = silu_linear(fr2, params["wq_t_bf16"], params["bq_scaled"])   # (b*nq, inner) bf16
    kv = silu_linear(to2, params["wkv_t_bf16"], params["bkv"])       # (b*nk, 2*inner) bf16

    # Head split outside the kernel -> head_dim-full per-head blocks.
    q4 = q.reshape(b, nq, n_head, D).transpose(0, 2, 1, 3)
    k4 = kv[:, :inner].reshape(b, nk, n_head, D).transpose(0, 2, 1, 3)
    v4 = kv[:, inner:].reshape(b, nk, n_head, D).transpose(0, 2, 1, 3)

    out4 = flash_mha(q4, k4, v4)                                     # (b, h, nq, D) bf16
    out = out4.transpose(0, 2, 1, 3).reshape(b, nq, inner)
    return out.astype(jnp.float32)


def init_params(key, dim, n_head, head_dim):
    inner = n_head * head_dim
    scale = head_dim ** (-0.5)
    k1, k2, k3, k4 = jax.random.split(key, 4)
    # PyTorch Linear stores weight as (out_features, in_features); we pass W^T.
    wq = jax.random.normal(k1, (inner, dim), jnp.float32) * 0.02
    bq = jax.random.normal(k2, (inner,), jnp.float32) * 0.02
    wkv = jax.random.normal(k3, (2 * inner, dim), jnp.float32) * 0.02
    bkv = jax.random.normal(k4, (2 * inner,), jnp.float32) * 0.02
    return {
        "n_head": n_head,
        "head_dim": head_dim,
        # f32 master copies (reference path)
        "wq_t": wq.T,                                  # (dim, inner)
        "bq": bq.reshape(1, inner),
        "wkv_t": wkv.T,                                # (dim, 2*inner)
        "bkv": bkv.reshape(1, 2 * inner),
        # kernel parameters: bf16 weights, softmax scale folded into Q proj
        "wq_t_bf16": (wq.T * scale).astype(jnp.bfloat16),
        "bq_scaled": (bq * scale).reshape(1, inner).astype(jnp.float32),
        "wkv_t_bf16": wkv.T.astype(jnp.bfloat16),
    }


# Pure-JAX f32 reference for the correctness check
def _reference(params, fr, to=None):
    if to is None:
        to = fr
    n_head, head_dim = params["n_head"], params["head_dim"]
    inner = n_head * head_dim
    scale = head_dim ** (-0.5)

    def silu(x):
        return x * jax.nn.sigmoid(x)

    q = silu(fr) @ params["wq_t"] + params["bq"][0]
    kv = silu(to) @ params["wkv_t"] + params["bkv"][0]
    k, v = kv[..., :inner], kv[..., inner:]
    b, nq, _ = fr.shape
    nk = to.shape[1]

    def sh(t, n):
        return t.reshape(b, n, n_head, head_dim).transpose(0, 2, 1, 3)

    qh, kh, vh = sh(q, nq), sh(k, nk), sh(v, nk)
    dots = jnp.einsum("bhqd,bhkd->bhqk", qh, kh) * scale
    attn = jax.nn.softmax(dots, axis=-1)
    out = jnp.einsum("bhqk,bhkd->bhqd", attn, vh)
    return out.transpose(0, 2, 1, 3).reshape(b, nq, inner)


if __name__ == "__main__":
    # Small shapes: batch=2, seq=8, dim=32, n_head=4, head_dim=8
    b, n, dim = 2, 8, 32
    n_head, head_dim = 4, 8

    key = jax.random.PRNGKey(0)
    kp, kx = jax.random.split(key)
    params = init_params(kp, dim, n_head, head_dim)
    fr = jax.random.normal(kx, (b, n, dim), jnp.float32)

    out = attention_forward(params, fr)          # to=None -> self-attention
    out = jax.block_until_ready(out)

    ref = _reference(params, fr)
    assert out.shape == (b, n, n_head * head_dim)
    # bf16 operands/activations + approx reciprocal -> bf16-level tolerance.
    assert jnp.allclose(out, ref, atol=2e-2, rtol=2e-2), "mismatch vs reference"

    print("KERNEL_OK")
</pallas_src>

<mosaic_0001>
module attributes {stable_mosaic.version = 11 : i64} {
  func.func @_silu_linear_kernel(%arg0: i32, %arg1: i32, %arg2: i32, %arg3: memref<16x32xbf16, #tpu.memory_space<vmem>>, %arg4: memref<32x32xbf16, #tpu.memory_space<vmem>>, %arg5: memref<1x32xf32, #tpu.memory_space<vmem>>, %arg6: memref<16x32xbf16, #tpu.memory_space<vmem>>, %arg7: memref<16x32xf32, #tpu.memory_space<vmem>>) attributes {dimension_semantics = [#tpu.dimension_semantics<parallel>, #tpu.dimension_semantics<parallel>, #tpu.dimension_semantics<arbitrary>], iteration_bounds = array<i64: 1, 1, 1>, scalar_prefetch = 0 : i64, scratch_operands = 1 : i64, tpu.core_type = #tpu.core_type<tc>, window_params = [{transform_indices = @transform_0, window_bounds = array<i64: 16, 32>}, {transform_indices = @transform_1, window_bounds = array<i64: 32, 32>}, {transform_indices = @transform_2, window_bounds = array<i64: 1, 32>}, {transform_indices = @transform_3, window_bounds = array<i64: 16, 32>}]} {
    %c0_i32 = arith.constant 0 : i32
    %0 = arith.cmpi eq, %arg2, %c0_i32 : i32
    %1 = arith.extui %0 : i1 to i32
    %c0_i32_0 = arith.constant 0 : i32
    %2 = arith.cmpi ne, %1, %c0_i32_0 : i32
    scf.if %2 {
      %cst_11 = arith.constant 0.000000e+00 : f32
      %20 = vector.broadcast %cst_11 : f32 to vector<16x32xf32>
      %c0_12 = arith.constant 0 : index
      %c0_13 = arith.constant 0 : index
      %21 = vector.load %arg7[%c0_12, %c0_13] : memref<16x32xf32, #tpu.memory_space<vmem>>, vector<16x32xf32>
      tpu.vector_store %arg7[%c0_12, %c0_13], %20 {strides = array<i32>} : memref<16x32xf32, #tpu.memory_space<vmem>>, vector<16x32xf32>,
    } else {
    }
    %c0 = arith.constant 0 : index
    %c0_1 = arith.constant 0 : index
    %3 = vector.load %arg3[%c0, %c0_1] : memref<16x32xbf16, #tpu.memory_space<vmem>>, vector<16x32xbf16>
    %4 = arith.extf %3 : vector<16x32xbf16> to vector<16x32xf32>
    %5 = arith.negf %4 : vector<16x32xf32>
    %6 = math.exp %5 : vector<16x32xf32>
    %cst = arith.constant 1.000000e+00 : f32
    %7 = vector.broadcast %cst : f32 to vector<16x32xf32>
    %8 = arith.addf %7, %6 : vector<16x32xf32>
    %9 = arith.divf %7, %8 : vector<16x32xf32>
    %10 = arith.mulf %4, %9 : vector<16x32xf32>
    %11 = arith.truncf %10 : vector<16x32xf32> to vector<16x32xbf16>
    %c0_2 = arith.constant 0 : index
    %c0_3 = arith.constant 0 : index
    %12 = vector.load %arg7[%c0_2, %c0_3] : memref<16x32xf32, #tpu.memory_space<vmem>>, vector<16x32xf32>
    %c0_4 = arith.constant 0 : index
    %c0_5 = arith.constant 0 : index
    %13 = vector.load %arg4[%c0_4, %c0_5] : memref<32x32xbf16, #tpu.memory_space<vmem>>, vector<32x32xbf16>
    %cst_6 = arith.constant dense<0.000000e+00> : vector<16x32xf32>
    %14 = tpu.matmul %11, %13, %cst_6 {dimension_numbers = #tpu.dot_dimension_numbers<[1], [0], [0], [1], [0, 0, 1, 1], [], []>} : vector<16x32xbf16>, vector<32x32xbf16>, vector<16x32xf32> -> vector<16x32xf32>
    %15 = arith.addf %12, %14 : vector<16x32xf32>
    %c0_7 = arith.constant 0 : index
    %c0_8 = arith.constant 0 : index
    %16 = vector.load %arg7[%c0_7, %c0_8] : memref<16x32xf32, #tpu.memory_space<vmem>>, vector<16x32xf32>
    tpu.vector_store %arg7[%c0_7, %c0_8], %15 {strides = array<i32>} : memref<16x32xf32, #tpu.memory_space<vmem>>, vector<16x32xf32>,
    %c0_i32_9 = arith.constant 0 : i32
    %17 = arith.cmpi eq, %arg2, %c0_i32_9 : i32
    %18 = arith.extui %17 : i1 to i32
    %c0_i32_10 = arith.constant 0 : i32
    %19 = arith.cmpi ne, %18, %c0_i32_10 : i32
    scf.if %19 {
      %c0_11 = arith.constant 0 : index
      %c0_12 = arith.constant 0 : index
      %20 = vector.load %arg7[%c0_11, %c0_12] : memref<16x32xf32, #tpu.memory_space<vmem>>, vector<16x32xf32>
      %c0_13 = arith.constant 0 : index
      %c0_14 = arith.constant 0 : index
      %21 = vector.load %arg5[%c0_13, %c0_14] : memref<1x32xf32, #tpu.memory_space<vmem>>, vector<1x32xf32>
      %22 = vector.broadcast %21 : vector<1x32xf32> to vector<16x32xf32>
      %23 = arith.addf %20, %22 : vector<16x32xf32>
      %24 = arith.truncf %23 : vector<16x32xf32> to vector<16x32xbf16>
      %c0_15 = arith.constant 0 : index
      %c0_16 = arith.constant 0 : index
      %25 = vector.load %arg6[%c0_15, %c0_16] : memref<16x32xbf16, #tpu.memory_space<vmem>>, vector<16x32xbf16>
      tpu.vector_store %arg6[%c0_15, %c0_16], %24 {strides = array<i32>} : memref<16x32xbf16, #tpu.memory_space<vmem>>, vector<16x32xbf16>,
    } else {
    }
    return
  }
  func.func @transform_0(%arg0: i32, %arg1: i32, %arg2: i32) -> (i32, i32) {
    %c0_i32 = arith.constant 0 : i32
    return %arg0, %arg2 : i32, i32
  }
  func.func @transform_1(%arg0: i32, %arg1: i32, %arg2: i32) -> (i32, i32) {
    %c0_i32 = arith.constant 0 : i32
    return %arg2, %arg1 : i32, i32
  }
  func.func @transform_2(%arg0: i32, %arg1: i32, %arg2: i32) -> (i32, i32) {
    %c0_i32 = arith.constant 0 : i32
    %c0_i32_0 = arith.constant 0 : i32
    return %c0_i32, %arg1 : i32, i32
  }
  func.func @transform_3(%arg0: i32, %arg1: i32, %arg2: i32) -> (i32, i32) {
    %c0_i32 = arith.constant 0 : i32
    return %arg0, %arg1 : i32, i32
  }
}

</mosaic_0001>

<bundles_post_ra>
// kernel: tpu_custom_call.1
= control target key start
LH: loop header
LB: loop body
LE: loop exit
PB: predicated region body
PF: predicated region fallthrough
CT: control target
= control target key end

     0   :  { %8 = vsyncpa [#allocation4], 0  ;;  %s341_s0 = inlined_call_operand.hbm [shape: bf16[16,32], index: 0, kind: input, shape index: {}]   ;;  %s342_s1 = inlined_call_operand.hbm [shape: bf16[32,32], index: 1, kind: input, shape index: {}]   ;;  %s343_s2 = inlined_call_operand.vmem [shape: f32[1,32], index: 2, kind: input, shape index: {}]   ;;  %s344_s3 = inlined_call_operand.hbm [shape: bf16[16,32], index: 3, kind: output, shape index: {}]  }
   0x1   :  { %9 = vsyncpa [#allocation7], 0 }
   0x2   :  { %10 = vsyncpa [#allocation5], 0  ;;  %s288_s12 = smov [#allocation3]  }
   0x3   :  { %s16_s13 = sshll.u32 %s288_s12, 4  ;;  %s17_s13 = int_to_ptr.vmem [resolvable:$true] %s16_s13 }
   0x4   :  { %s230_s14 = scalar_lea.vmem %s17_s13, 128  ;;  %p235_p1 = scmp.lt.s32.totalorder %s17_s13, %s17_s13 }
   0x5   :  { %p231_p0 = scmp.ne.s32.totalorder %s17_s13, %s230_s14  ;;  %p236_p2 = scmp.lt.s32.totalorder %s230_s14, %s230_s14 }
   0x7   :  { %p237_p3 = por %p236_p2, %p235_p1 }
   0x9   :  { %p238_p4 = pnand %p237_p3, %p231_p0 }
   0xb   :  { %241 = shalt.err (!%p238_p4)
}
   0xc   :  { %s289_s15 = smov 64   ;;  %s290_s16 = smov 4  }
   0xd   :  { %22 = dma.hbm_to_vmem [thread:$0]  %s341_s0, 128, %s17_s13, [#allocation4], %s289_s15, %s289_s15, %s290_s16  }
   0xe   :  { %s291_s19 = smov [#allocation6]  }
   0xf   :  { %s28_s20 = sshll.u32 %s291_s19, 4  ;;  %s29_s20 = int_to_ptr.vmem [resolvable:$true] %s28_s20 }
  0x10   :  { %s250_s21 = scalar_lea.vmem %s29_s20, 256  ;;  %p255_p6 = scmp.lt.s32.totalorder %s29_s20, %s29_s20 }
  0x11   :  { %p251_p5 = scmp.ne.s32.totalorder %s29_s20, %s250_s21  ;;  %p256_p7 = scmp.lt.s32.totalorder %s250_s21, %s250_s21 }
  0x13   :  { %p257_p8 = por %p256_p7, %p255_p6 }
  0x15   :  { %p258_p9 = pnand %p257_p8, %p251_p5 }
  0x17   :  { %261 = shalt.err (!%p258_p9)
}
  0x18   :  { %34 = dma.hbm_to_vmem [thread:$0]  %s342_s1, 256, %s29_s20, [#allocation7], %s289_s15, %s289_s15, %s290_s16  }
  0x19   :  { %282 = dma.done.wait [#allocation4], 128  }
  0x1a   :  { %283 = vsyncadd [#allocation4], 4294967168 }
  0x1b   :  { %284 = dma.done.wait [#allocation7], 256  }
  0x1c   :  { %285 = vsyncadd [#allocation7], 4294967040  ;;  %vm48_vm0 = vcmask 261120   ;;  %v292_v0 = vmov 0.0   ;;  %vm293_vm1 = vmmov 0   ;;  %v212_v1 = vld [vmem:[#allocation6 + $0x8] sm:$0xff]  }
  0x1d   :  { %197 = vmatprep.subr.bf16.mxu0 %v292_v0  ;;  %201 = vmatprep.mubr.msk.bf16.mxu0 %vm293_vm1, %v292_v0  ;;  %49 = vst.msk [vmem:[#allocation2] sm:$0xff] %vm48_vm0, %v292_v0  ;;  %50 = vst.msk [vmem:[#allocation2 + $0x8] sm:$0xff] %vm48_vm0, %v292_v0  ;;  %v213_v2 = vld [vmem:[#allocation6] sm:$0xff]   ;;  %v191_v3 = vld [vmem:[#allocation3] sm:$0xff]   ;;  %vm159_vm2 = vcmask 257024   ;;  %s294_s24 = smov [#allocation8]  }
  0x1e   :  { %198 = vmatpush3.bf16.msra.mxu0 %v212_v1  ;;  %v192_v4 = vunpack.c.l.bf16 %v191_v3  ;;  %v193_v5 = vunpack.c.h.bf16 %v191_v3  ;;  %v185_v25 = vld [vmem:[%s343_s2] ss:$0 sm:$0xff]  ;;  %s167_s25 = sshll.u32 %s294_s24, 4  ;;  %s168_s25 = int_to_ptr.vmem [resolvable:$true] %s167_s25 }
  0x1f   :  { %199 = vmatprep.subr.bf16.mxu0 %v292_v0  ;;  %s262_s26 = scalar_lea.vmem %s168_s25, 128  ;;  %p267_p11 = scmp.lt.s32.totalorder %s168_s25, %s168_s25 }
  0x20   :  { %v180_v6 = vmul.f32 -1.442695, %v192_v4  ;;  %v181_v7 = vmul.f32 -1.442695, %v193_v5  ;;  %p263_p10 = scmp.ne.s32.totalorder %s168_s25, %s262_s26  ;;  %p268_p12 = scmp.lt.s32.totalorder %s262_s26, %s262_s26 }
  0x22   :  { %200 = vmatpush3.bf16.msra.mxu0 %v213_v2  ;;  %214 = vpow2.f32 %v180_v6  ;;  %p269_p13 = por %p268_p12, %p267_p11 }
  0x23   :  { %216 = vpow2.f32 %v181_v7 }
  0x24   :  { %v70_v17 = vld [vmem:[#allocation2] sm:$0xff]  ;;  %v71_v21 = vld [vmem:[#allocation2 + $0x8] sm:$0xff]  ;;  %p270_p0 = pnand %p269_p13, %p263_p10 }
  0x2f   :  { %v215_v8 = vpop.eup %214 }
  0x30   :  { %v217_v9 = vpop.eup %216  ;;  %v61_v10 = vadd.f32 1.0, %v215_v8 }
  0x31   :  { %v62_v11 = vadd.f32 1.0, %v217_v9 }
  0x32   :  { %218 = vrcp.f32 %v61_v10 }
  0x33   :  { %220 = vrcp.f32 %v62_v11 }
  0x3f   :  { %v219_v12 = vpop.eup %218 }
  0x40   :  { %v221_v13 = vpop.eup %220  ;;  %v67_v14 = vmul.f32 %v219_v12, %v192_v4 }
  0x41   :  { %v68_v15 = vmul.f32 %v221_v13, %v193_v5 }
  0x43   :  { %v69_v16 = vpack.c.bf16 %v68_v15, %v67_v14 }
  0x45   :  { %202 = vmatmul.mubr.msk.bf16.vlgmr.msra.gmra.mxu0 %vm48_vm0, %v69_v16 }
 0x105   :  { %v126_v18 = vpop.f32.mrf.mxu0 }
 0x106   :  { %v133_v19 = vadd.f32 %v126_v18, %v70_v17 }
 0x107   :  { %v203_v20 = vpop.f32.mrf.mxu0 }
 0x108   :  { %135 = vst.msk [vmem:[#allocation2] sm:$0xff] %vm48_vm0, %v133_v19 }
 0x109   :  { %v129_v22 = vpop.f32.mrf.mxu0 }
 0x10a   :  { %v134_v23 = vadd.f32 %v129_v22, %v71_v21 }
 0x10b   :  { %v204_v24 = vpop.f32.mrf.mxu0 }
 0x10c   :  { %136 = vst.msk [vmem:[#allocation2 + $0x8] sm:$0xff] %vm48_vm0, %v134_v23 }
 0x10f   :  { %v140_v26 = vld [vmem:[#allocation2] sm:$0xff] }
 0x110   :  { %v149_v27 = vadd.f32 %v185_v25, %v140_v26 }
 0x112   :  { %v188_v28 = vpack.c.bf16 %v149_v27, %v149_v27 }
 0x113   :  { %v141_v29 = vld [vmem:[#allocation2 + $0x8] sm:$0xff] }
 0x114   :  { %v150_v30 = vadd.f32 %v185_v25, %v141_v29  ;;  %160 = vst.msk [vmem:[#allocation8] sm:$0xf] %vm159_vm2, %v188_v28 }
 0x116   :  { %v189_v31 = vpack.c.bf16 %v150_v30, %v150_v30 }
 0x118   :  { %161 = vst.msk [vmem:[#allocation8 + $0x4] sm:$0xf] %vm159_vm2, %v189_v31 }
 0x119   :  { %273 = shalt.err (!%p270_p0)
}
 0x11a   :  { %173 = dma.vmem_to_hbm [thread:$0]  %s168_s25, 128, %s344_s3, [#allocation5], %s289_s15, %s289_s15, %s290_s16  }
 0x11b   :  { %286 = dma.done.wait [#allocation5], 128  }
 0x11c   :  { %287 = vsyncadd [#allocation5], 4294967168 }
 0x11d   :  { %177 = vsyncpa [#allocation4], 1 }
 0x11e   :  { %178 = vsyncpa [#allocation7], 1 }
 0x11f   :  { %179 = vsyncpa [#allocation5], 1 }

</bundles_post_ra>
